<compile_context>
chip_gen: v7x
topology: tpu7x:2x2x1
jax: 0.10.0
libtpu: 0.0.40
codegen_flags: <defaults>
</compile_context>

<pallas_src>
import functools
import math

import jax
import jax.numpy as jnp
import numpy as np
from jax.experimental import pallas as pl
from jax.experimental.pallas import tpu as pltpu


# Each of difflogic's 16 relaxed binary gates expressed in the basis {1, a, b, a*b}.
_GATE_BASIS = np.array([
    # 1    a    b    ab
    [0.,  0.,  0.,  0.],   # 0  False
    [0.,  0.,  0.,  1.],   # 1  a AND b
    [0.,  1.,  0., -1.],   # 2  a AND NOT b
    [0.,  1.,  0.,  0.],   # 3  a
    [0.,  0.,  1., -1.],   # 4  NOT a AND b
    [0.,  0.,  1.,  0.],   # 5  b
    [0.,  1.,  1., -2.],   # 6  a XOR b
    [0.,  1.,  1., -1.],   # 7  a OR b
    [1., -1., -1.,  1.],   # 8  NOR
    [1., -1., -1.,  2.],   # 9  XNOR
    [1.,  0., -1.,  0.],   # 10 NOT b
    [1.,  0., -1.,  1.],   # 11 a OR NOT b
    [1., -1.,  0.,  0.],   # 12 NOT a
    [1., -1.,  0.,  1.],   # 13 NOT a OR b
    [1.,  0.,  0., -1.],   # 14 NAND
    [1.,  0.,  0.,  0.],   # 15 True
], dtype=np.float32)


def _round_up(x, m):
    return ((x + m - 1) // m) * m


def _vmem_capacity_bytes():
    """Generation-aware VMEM capacity (falls back to the smallest, v7x-class, 64 MiB)."""
    try:
        return int(pltpu.get_tpu_info().vmem_capacity_bytes)
    except Exception:
        return 64 << 20


# ----------------------------- Pallas kernel --------------------------------
def _logic_tree_kernel(x_ref, sel_ref, coeff_ref, o_ref, *, depth, level_offsets):
    """In-kernel leaf gather (0/1 selection matmul on the idle MXU) followed by
    `depth` folded logic-tree levels: x <- c0 + c1*a + c2*b + c3*a*b."""
    # Leaf expansion: one-hot (K, ck) @ (ck, t) at HIGHEST precision is an exact
    # per-row copy; the expanded (K, N) slab never touches HBM.
    x = jnp.dot(sel_ref[...], x_ref[...].astype(jnp.float32),
                preferred_element_type=jnp.float32,
                precision=jax.lax.Precision.HIGHEST)
    coeffs = coeff_ref[...]                           # (sum_halves, 4), packed per level
    width = x.shape[0]
    for l in range(depth):
        half = width // 2
        a = x[:half, :]                               # halves layout: a = top, b = bottom
        b = x[half:width, :]
        off = level_offsets[l]
        c = coeffs[off:off + half, :]                 # static, sublane-aligned slice
        c0 = c[:, 0:1]
        c1 = c[:, 1:2]
        c2 = c[:, 2:3]
        c3 = c[:, 3:4]
        # Exact folding of sum_k p_k * gate_k(a, b); Horner-style: 3 mul + 3 add.
        x = (c0 + c1 * a) + b * (c2 + c3 * a)
        width = half
    o_ref[...] = x.astype(o_ref.dtype)


def _pick_row_tile(n, per_lane_bytes, budget_bytes, max_tile=8192):
    """Largest power-of-two lane tile fitting the VMEM budget; shrunk (>=256) when
    n itself is small so we don't pad far past the data."""
    t = max_tile
    while t > 256 and per_lane_bytes * t > budget_bytes:
        t //= 2
    n_up = _round_up(n, 128)
    while t > 256 and t // 2 >= n_up:
        t //= 2
    return max(t, 128)


def logic_tree_pallas(x_cols, sel, coeffs_packed, *, depth, level_offsets, oc_p,
                      row_tile, vmem_limit_bytes=None):
    ck_p, n = x_cols.shape
    kdim = sel.shape[0]
    assert n % row_tile == 0 and row_tile % 128 == 0
    kernel = functools.partial(_logic_tree_kernel, depth=depth,
                               level_offsets=tuple(int(o) for o in level_offsets))

    in_specs = [
        pl.BlockSpec((ck_p, row_tile), lambda i: (0, i)),     # compact patch slab (tiled)
        pl.BlockSpec(sel.shape, lambda i: (0, 0)),            # constant selection matrix
        pl.BlockSpec(coeffs_packed.shape, lambda i: (0, 0)),  # packed per-level coefficients
    ]
    cost = pl.CostEstimate(
        flops=int(2 * kdim * ck_p * n + 6 * (kdim - oc_p) * n),
        transcendentals=0,
        bytes_accessed=int(n * ck_p * x_cols.dtype.itemsize + n * oc_p * 4
                           + sel.size * 4 + coeffs_packed.size * 4),
    )
    return pl.pallas_call(
        kernel,
        out_shape=jax.ShapeDtypeStruct((oc_p, n), jnp.float32),
        grid_spec=pltpu.PrefetchScalarGridSpec(
            num_scalar_prefetch=0,
            grid=(n // row_tile,),
            in_specs=in_specs,
            out_specs=pl.BlockSpec((oc_p, row_tile), lambda i: (0, i)),
        ),
        compiler_params=pltpu.CompilerParams(
            dimension_semantics=("parallel",),
            vmem_limit_bytes=vmem_limit_bytes,
        ),
        cost_estimate=cost,
    )(x_cols, sel, coeffs_packed)


# --------------------------- Module (JAX glue) -------------------------------
class ConvolutionalLogicTree:
    def __init__(self, in_channels, out_channels, depth, receptive_field,
                 grad_factor=1.0, stride=1, pad=True, key=None):
        if key is None:
            key = jax.random.PRNGKey(0)
        self.in_channels = in_channels
        self.out_channels = out_channels
        self.depth = depth
        self.receptive_field = receptive_field
        self.grad_factor = grad_factor          # identity in forward
        self.stride = stride
        self.pad = pad
        self.offset = receptive_field // 2
        self.num_inputs_per_tree = 2 ** depth
        self.lgn_dim = [2 ** depth // 2 ** i * out_channels for i in range(depth + 1)]

        rf2 = receptive_field * receptive_field
        self.compact_k = in_channels * rf2
        self.compact_k_p = _round_up(self.compact_k, 8)

        scale = math.ceil(out_channels / in_channels)
        assert 2 <= scale
        tmp = jnp.stack([jnp.arange(in_channels) for _ in range(scale)])
        self.out_channels_in_idx = jnp.stack(
            [tmp.flatten(), tmp.T.flatten()], axis=-1)[:out_channels]

        keys = jax.random.split(key, out_channels)
        self.indices = jnp.stack(
            [jax.random.permutation(keys[i], rf2 * 2)[: self.num_inputs_per_tree]
             for i in range(out_channels)])

        # Natural flat gather map (channel-major, leaf-minor) — used by reference().
        idx0 = np.asarray(self.out_channels_in_idx[:, 0])[:, None]
        idx1 = np.asarray(self.out_channels_in_idx[:, 1])[:, None]
        ind = np.asarray(self.indices)
        chan = np.where(ind < rf2, idx0, idx1)                  # (OC, 2^d)
        pos = ind % rf2
        flat_gather = (chan * rf2 + pos).reshape(-1)            # (OC * 2^d,)
        self.flat_gather = jnp.asarray(flat_gather)

        # ---- kernel-side structures, OC padded to 8 so all levels stay sublane aligned ----
        self.oc_p = _round_up(out_channels, 8)
        self.kdim = self.oc_p * self.num_inputs_per_tree
        flat_gather_p = np.zeros((self.kdim,), dtype=np.int64)
        flat_gather_p[: out_channels * self.num_inputs_per_tree] = flat_gather
        # (padded trees read compact row 0; their output rows are sliced away)

        # "Halves" permutation per tree level (kernel layout: level l pairs x[:half], x[half:]).
        perms = [None] * (depth + 1)
        perms[depth] = np.arange(self.oc_p)
        for l in range(depth - 1, -1, -1):
            nxt = perms[l + 1]
            perms[l] = np.concatenate([2 * nxt, 2 * nxt + 1])

        # 0/1 leaf-selection matrix (K, compact_k_p): the in-kernel gather on the MXU.
        fused_gather = flat_gather_p[perms[0]]
        sel = np.zeros((self.kdim, self.compact_k_p), dtype=np.float32)
        sel[np.arange(self.kdim), fused_gather] = 1.0
        self.sel_matrix = jnp.asarray(sel)

        # Residual-init LogicLayer weights (values from the PyTorch module __init__),
        # softmax as in difflogic's training-mode forward (computed in float64 for an
        # exact fold), then folded into 4 coefficients per leaf via the {1,a,b,ab} basis.
        w_row = np.array([0.067] * 3 + [8.995] + [0.067] * 12, dtype=np.float64)
        p_row = np.exp(w_row - w_row.max())
        p_row /= p_row.sum()
        basis64 = _GATE_BASIS.astype(np.float64)

        self.level_halves = [self.oc_p * (2 ** (depth - 1 - l)) for l in range(depth)]
        offs = np.concatenate([[0], np.cumsum(self.level_halves)])[:depth]
        self.level_offsets = [int(v) for v in offs]

        self.probs_natural = []   # per layer: (out_dim, 16) — used by reference()
        coeff_blocks = []         # per layer: (half_p, 4), rows in kernel "halves" order
        for l in range(depth):
            out_dim_p = self.level_halves[l]
            p = np.tile(p_row, (out_dim_p, 1))                  # (out_dim_p, 16), float64
            self.probs_natural.append(
                jnp.asarray(p[: self.lgn_dim[l + 1]], dtype=jnp.float32))
            coeff_blocks.append(p[perms[l + 1]] @ basis64)
        self.coeffs_packed = jnp.asarray(np.concatenate(coeff_blocks, axis=0),
                                         dtype=jnp.float32)

    # Compact patch slab, already in the transposed (C*rf*rf, bs*h*w) orientation.
    def _build_patches(self, x):
        bs, c, hh, ww = x.shape
        rf, s, off = self.receptive_field, self.stride, self.offset
        if self.pad:
            h, w = hh, ww
            xp = jnp.pad(x, ((0, 0), (0, 0), (off, off), (off, off)))
        else:
            h, w = hh - 2 * off, ww - 2 * off
            xp = x
        n_h = (xp.shape[2] - rf) // s + 1
        n_w = (xp.shape[3] - rf) // s + 1
        assert (n_h, n_w) == (h, w), "stride / receptive-field combination inconsistent"
        # torch: x.unfold(2, rf, s).unfold(3, rf, s).flatten(start_dim=4)
        slices = []
        for u in range(rf):
            for v in range(rf):
                slices.append(xp[:, :, u:u + (n_h - 1) * s + 1:s,
                                 v:v + (n_w - 1) * s + 1:s])
        patches = jnp.stack(slices, axis=0)                      # (rf*rf, bs, C, h, w)
        patches = jnp.transpose(patches, (2, 0, 1, 3, 4))        # (C, rf*rf, bs, h, w)
        patches = patches.reshape(c * rf * rf, bs * h * w)       # (C*rf*rf, N)
        return patches.astype(jnp.float32), h, w

    def __call__(self, x, max_row_tile=8192, slab_dtype=jnp.float32):
        bs = x.shape[0]
        patches, h, w = self._build_patches(x)                   # (compact_k, bs*h*w)
        n = patches.shape[1]

        itemsize = jnp.dtype(slab_dtype).itemsize
        per_lane_bytes = (2 * self.compact_k_p * itemsize        # double-buffered input
                          + 3 * self.kdim * 4                    # in-kernel intermediates
                          + 2 * self.oc_p * 4)                   # double-buffered output
        vmem_cap = _vmem_capacity_bytes()
        scoped_cap = min(vmem_cap // 2, 64 << 20)                # ~32 MiB v7x, 64 MiB v5e/v6e
        row_tile = _pick_row_tile(n, per_lane_bytes, scoped_cap // 2,
                                  max_tile=max_row_tile)

        # Pad only the *compact* slab (rows to a sublane multiple, lanes to the tile).
        r_pad = self.compact_k_p - patches.shape[0]
        n_pad = (-n) % row_tile
        slab = jnp.pad(patches, ((0, r_pad), (0, n_pad))).astype(slab_dtype)

        out_cols = logic_tree_pallas(
            slab, self.sel_matrix, self.coeffs_packed,
            depth=self.depth, level_offsets=self.level_offsets,
            oc_p=self.oc_p, row_tile=row_tile,
            vmem_limit_bytes=scoped_cap,
        )[: self.out_channels, :n]
        out = out_cols.reshape(self.out_channels, bs, h, w)
        return jnp.transpose(out, (1, 0, 2, 3))                  # NCHW, like PyTorch

    # Pure-JAX reference: natural leaf order, original interleaved (2j, 2j+1) pairing,
    # full 16-gate mixture, elementwise-only math (no MXU, so no precision surprises).
    def reference(self, x):
        bs = x.shape[0]
        patches, h, w = self._build_patches(x)
        y = jnp.transpose(patches[self.flat_gather, :], (1, 0))  # (N, OC*2^d)
        for l in range(self.depth):
            a, b = y[:, 0::2], y[:, 1::2]
            p = self.probs_natural[l]                            # (out_dim, 16)
            ab = a * b
            ops = jnp.stack([
                jnp.zeros_like(a), ab, a - ab, a, b - ab, b,
                a + b - 2 * ab, a + b - ab, 1 - (a + b - ab), 1 - (a + b - 2 * ab),
                1 - b, 1 - b + ab, 1 - a, 1 - a + ab, 1 - ab, jnp.ones_like(a),
            ], axis=-1)                                          # (N, out_dim, 16)
            y = (ops * p[None, :, :]).sum(axis=-1)
        out = y.reshape(bs, h, w, self.out_channels)
        return jnp.transpose(out, (0, 3, 1, 2))


if __name__ == "__main__":
    key = jax.random.PRNGKey(0)
    k_mod, k_x = jax.random.split(key)

    in_channels, out_channels, depth, receptive_field = 4, 8, 3, 3
    mod = ConvolutionalLogicTree(in_channels, out_channels, depth, receptive_field,
                                 grad_factor=1.0, stride=1, pad=True, key=k_mod)

    x = jax.random.uniform(k_x, (2, in_channels, 16, 16), dtype=jnp.float32)

    out = jax.block_until_ready(mod(x))
    ref = jax.block_until_ready(mod.reference(x))

    assert out.shape == (2, out_channels, 16, 16), out.shape
    np.testing.assert_allclose(np.asarray(out), np.asarray(ref), rtol=1e-5, atol=1e-5)
    print("KERNEL_OK")
</pallas_src>

<mosaic_0001>
module attributes {stable_mosaic.version = 11 : i64} {
  func.func @_logic_tree_kernel(%arg0: i32, %arg1: memref<40x512xf32, #tpu.memory_space<vmem>>, %arg2: memref<64x40xf32, #tpu.memory_space<vmem>>, %arg3: memref<56x4xf32, #tpu.memory_space<vmem>>, %arg4: memref<8x512xf32, #tpu.memory_space<vmem>>) attributes {dimension_semantics = [#tpu.dimension_semantics<parallel>], iteration_bounds = array<i64: 1>, scalar_prefetch = 0 : i64, scratch_operands = 0 : i64, tpu.core_type = #tpu.core_type<tc>, window_params = [{transform_indices = @transform_0, window_bounds = array<i64: 40, 512>}, {pipeline_mode = #tpu.pipeline_mode<synchronous>, transform_indices = @transform_1, window_bounds = array<i64: 64, 40>}, {pipeline_mode = #tpu.pipeline_mode<synchronous>, transform_indices = @transform_2, window_bounds = array<i64: 56, 4>}, {transform_indices = @transform_3, window_bounds = array<i64: 8, 512>}]} {
    %c0 = arith.constant 0 : index
    %c0_0 = arith.constant 0 : index
    %0 = vector.load %arg2[%c0, %c0_0] : memref<64x40xf32, #tpu.memory_space<vmem>>, vector<64x40xf32>
    %c0_1 = arith.constant 0 : index
    %c0_2 = arith.constant 0 : index
    %1 = vector.load %arg1[%c0_1, %c0_2] : memref<40x512xf32, #tpu.memory_space<vmem>>, vector<40x512xf32>
    %cst = arith.constant dense<0.000000e+00> : vector<64x512xf32>
    %2 = tpu.matmul %0, %1, %cst {dimension_numbers = #tpu.dot_dimension_numbers<[1], [0], [0], [1], [0, 0, 1, 1], [], []>, precision = #tpu.contract_precision<fp32>} : vector<64x40xf32>, vector<40x512xf32>, vector<64x512xf32> -> vector<64x512xf32>
    %c0_3 = arith.constant 0 : index
    %c0_4 = arith.constant 0 : index
    %3 = vector.load %arg3[%c0_3, %c0_4] : memref<56x4xf32, #tpu.memory_space<vmem>>, vector<56x4xf32>
    %4 = vector.extract_strided_slice %2 {offsets = [0, 0], sizes = [32, 512], strides = [1, 1]} : vector<64x512xf32> to vector<32x512xf32>
    %5 = vector.extract_strided_slice %2 {offsets = [32, 0], sizes = [32, 512], strides = [1, 1]} : vector<64x512xf32> to vector<32x512xf32>
    %6 = vector.extract_strided_slice %3 {offsets = [0, 0], sizes = [32, 4], strides = [1, 1]} : vector<56x4xf32> to vector<32x4xf32>
    %7 = vector.extract_strided_slice %6 {offsets = [0, 0], sizes = [32, 1], strides = [1, 1]} : vector<32x4xf32> to vector<32x1xf32>
    %8 = vector.extract_strided_slice %6 {offsets = [0, 1], sizes = [32, 1], strides = [1, 1]} : vector<32x4xf32> to vector<32x1xf32>
    %9 = vector.extract_strided_slice %6 {offsets = [0, 2], sizes = [32, 1], strides = [1, 1]} : vector<32x4xf32> to vector<32x1xf32>
    %10 = vector.extract_strided_slice %6 {offsets = [0, 3], sizes = [32, 1], strides = [1, 1]} : vector<32x4xf32> to vector<32x1xf32>
    %11 = vector.broadcast %8 : vector<32x1xf32> to vector<32x512xf32>
    %12 = arith.mulf %11, %4 : vector<32x512xf32>
    %13 = vector.broadcast %7 : vector<32x1xf32> to vector<32x512xf32>
    %14 = arith.addf %13, %12 : vector<32x512xf32>
    %15 = vector.broadcast %10 : vector<32x1xf32> to vector<32x512xf32>
    %16 = arith.mulf %15, %4 : vector<32x512xf32>
    %17 = vector.broadcast %9 : vector<32x1xf32> to vector<32x512xf32>
    %18 = arith.addf %17, %16 : vector<32x512xf32>
    %19 = arith.mulf %5, %18 : vector<32x512xf32>
    %20 = arith.addf %14, %19 : vector<32x512xf32>
    %21 = vector.extract_strided_slice %20 {offsets = [0, 0], sizes = [16, 512], strides = [1, 1]} : vector<32x512xf32> to vector<16x512xf32>
    %22 = vector.extract_strided_slice %20 {offsets = [16, 0], sizes = [16, 512], strides = [1, 1]} : vector<32x512xf32> to vector<16x512xf32>
    %23 = vector.extract_strided_slice %3 {offsets = [32, 0], sizes = [16, 4], strides = [1, 1]} : vector<56x4xf32> to vector<16x4xf32>
    %24 = vector.extract_strided_slice %23 {offsets = [0, 0], sizes = [16, 1], strides = [1, 1]} : vector<16x4xf32> to vector<16x1xf32>
    %25 = vector.extract_strided_slice %23 {offsets = [0, 1], sizes = [16, 1], strides = [1, 1]} : vector<16x4xf32> to vector<16x1xf32>
    %26 = vector.extract_strided_slice %23 {offsets = [0, 2], sizes = [16, 1], strides = [1, 1]} : vector<16x4xf32> to vector<16x1xf32>
    %27 = vector.extract_strided_slice %23 {offsets = [0, 3], sizes = [16, 1], strides = [1, 1]} : vector<16x4xf32> to vector<16x1xf32>
    %28 = vector.broadcast %25 : vector<16x1xf32> to vector<16x512xf32>
    %29 = arith.mulf %28, %21 : vector<16x512xf32>
    %30 = vector.broadcast %24 : vector<16x1xf32> to vector<16x512xf32>
    %31 = arith.addf %30, %29 : vector<16x512xf32>
    %32 = vector.broadcast %27 : vector<16x1xf32> to vector<16x512xf32>
    %33 = arith.mulf %32, %21 : vector<16x512xf32>
    %34 = vector.broadcast %26 : vector<16x1xf32> to vector<16x512xf32>
    %35 = arith.addf %34, %33 : vector<16x512xf32>
    %36 = arith.mulf %22, %35 : vector<16x512xf32>
    %37 = arith.addf %31, %36 : vector<16x512xf32>
    %38 = vector.extract_strided_slice %37 {offsets = [0, 0], sizes = [8, 512], strides = [1, 1]} : vector<16x512xf32> to vector<8x512xf32>
    %39 = vector.extract_strided_slice %37 {offsets = [8, 0], sizes = [8, 512], strides = [1, 1]} : vector<16x512xf32> to vector<8x512xf32>
    %40 = vector.extract_strided_slice %3 {offsets = [48, 0], sizes = [8, 4], strides = [1, 1]} : vector<56x4xf32> to vector<8x4xf32>
    %41 = vector.extract_strided_slice %40 {offsets = [0, 0], sizes = [8, 1], strides = [1, 1]} : vector<8x4xf32> to vector<8x1xf32>
    %42 = vector.extract_strided_slice %40 {offsets = [0, 1], sizes = [8, 1], strides = [1, 1]} : vector<8x4xf32> to vector<8x1xf32>
    %43 = vector.extract_strided_slice %40 {offsets = [0, 2], sizes = [8, 1], strides = [1, 1]} : vector<8x4xf32> to vector<8x1xf32>
    %44 = vector.extract_strided_slice %40 {offsets = [0, 3], sizes = [8, 1], strides = [1, 1]} : vector<8x4xf32> to vector<8x1xf32>
    %45 = vector.broadcast %42 : vector<8x1xf32> to vector<8x512xf32>
    %46 = arith.mulf %45, %38 : vector<8x512xf32>
    %47 = vector.broadcast %41 : vector<8x1xf32> to vector<8x512xf32>
    %48 = arith.addf %47, %46 : vector<8x512xf32>
    %49 = vector.broadcast %44 : vector<8x1xf32> to vector<8x512xf32>
    %50 = arith.mulf %49, %38 : vector<8x512xf32>
    %51 = vector.broadcast %43 : vector<8x1xf32> to vector<8x512xf32>
    %52 = arith.addf %51, %50 : vector<8x512xf32>
    %53 = arith.mulf %39, %52 : vector<8x512xf32>
    %54 = arith.addf %48, %53 : vector<8x512xf32>
    %c0_5 = arith.constant 0 : index
    %c0_6 = arith.constant 0 : index
    %55 = vector.load %arg4[%c0_5, %c0_6] : memref<8x512xf32, #tpu.memory_space<vmem>>, vector<8x512xf32>
    tpu.vector_store %arg4[%c0_5, %c0_6], %54 {strides = array<i32>} : memref<8x512xf32, #tpu.memory_space<vmem>>, vector<8x512xf32>,
    return
  }
  func.func @transform_0(%arg0: i32) -> (i32, i32) {
    %c0_i32 = arith.constant 0 : i32
    %c0_i32_0 = arith.constant 0 : i32
    return %c0_i32, %arg0 : i32, i32
  }
  func.func @transform_1(%arg0: i32) -> (i32, i32) {
    %c0_i32 = arith.constant 0 : i32
    %c0_i32_0 = arith.constant 0 : i32
    %c0_i32_1 = arith.constant 0 : i32
    return %c0_i32, %c0_i32_0 : i32, i32
  }
  func.func @transform_2(%arg0: i32) -> (i32, i32) {
    %c0_i32 = arith.constant 0 : i32
    %c0_i32_0 = arith.constant 0 : i32
    %c0_i32_1 = arith.constant 0 : i32
    return %c0_i32, %c0_i32_0 : i32, i32
  }
  func.func @transform_3(%arg0: i32) -> (i32, i32) {
    %c0_i32 = arith.constant 0 : i32
    %c0_i32_0 = arith.constant 0 : i32
    return %c0_i32, %arg0 : i32, i32
  }
}

</mosaic_0001>

<bundles_post_ra>
// kernel: tpu_custom_call.1
= control target key start
LH: loop header
LB: loop body
LE: loop exit
PB: predicated region body
PF: predicated region fallthrough
CT: control target
= control target key end

     0   :  { %v3429_v9 = vmov 0.0   ;;  %vm43_vm0 = vcmask 326656   ;;  %s3409_s0 = inlined_call_operand.vmem [shape: f32[40,512], index: 0, kind: input, shape index: {}]   ;;  %s3410_s1 = inlined_call_operand.vmem [shape: f32[64,40], index: 1, kind: input, shape index: {}]   ;;  %s3411_s2 = inlined_call_operand.vmem [shape: f32[56,4], index: 2, kind: input, shape index: {}]   ;;  %s3412_s3 = inlined_call_operand.hbm [shape: f32[8,512], index: 3, kind: output, shape index: {}]  }
   0x1   :  { %v24_v0 = vld [vmem:[%s3409_s0 + $0x8] sm:$0xff]  ;;  %v26_v2 = vld [vmem:[%s3409_s0 + $0x18] sm:$0xff]  ;;  %v23_v7 = vld [vmem:[%s3409_s0] sm:$0xff]  ;;  %142 = vmatprep.mubr.f32.mxu0 %v3429_v9  ;;  %1054 = vmatprep.mubr.f32.mxu1 %v3429_v9 }
   0x2   :  { %v28_v1 = vld [vmem:[%s3409_s0 + $0x28] sm:$0xff]  ;;  %v68_v3 = vand.u32 4294901760, %v24_v0  ;;  %v30_v5 = vld [vmem:[%s3409_s0 + $0x38] sm:$0xff]  ;;  %v980_v6 = vand.u32 4294901760, %v26_v2  ;;  %v27_v8 = vld [vmem:[%s3409_s0 + $0x20] sm:$0xff]  ;;  %v70_v11 = vand.u32 4294901760, %v23_v7 }
   0x3   :  { %v72_v4 = vand.u32 4294901760, %v28_v1  ;;  %v984_v10 = vand.u32 4294901760, %v30_v5  ;;  %v74_v12 = vand.u32 4294901760, %v27_v8  ;;  %v25_v13 = vld [vmem:[%s3409_s0 + $0x10] sm:$0xff]  ;;  %v32_v15 = vld [vmem:[%s3409_s0 + $0x48] sm:$0xff]  ;;  %v34_v21 = vld [vmem:[%s3409_s0 + $0x58] sm:$0xff] }
   0x4   :  { %v29_v14 = vld [vmem:[%s3409_s0 + $0x30] sm:$0xff]  ;;  %v2566_v17 = vsub.f32 %v24_v0, %v68_v3  ;;  %v2570_v19 = vsub.f32 %v26_v2, %v980_v6  ;;  %v36_v20 = vld [vmem:[%s3409_s0 + $0x68] sm:$0xff]  ;;  %v38_v22 = vld [vmem:[%s3409_s0 + $0x78] sm:$0xff]  ;;  %v2587_v26 = vsub.f32 %v23_v7, %v70_v11  ;;  %v982_v29 = vand.u32 4294901760, %v25_v13 }
   0x5   :  { %v2564_v16 = vpack.c.bf16 %v72_v4, %v68_v3  ;;  %v2568_v18 = vsub.f32 %v28_v1, %v72_v4  ;;  %v2581_v23 = vpack.c.bf16 %v984_v10, %v980_v6  ;;  %v2583_v24 = vsub.f32 %v30_v5, %v984_v10  ;;  %v31_v27 = vld [vmem:[%s3409_s0 + $0x40] sm:$0xff]  ;;  %v33_v37 = vld [vmem:[%s3409_s0 + $0x50] sm:$0xff]  ;;  %v2617_v43 = vld [vmem:[%s3409_s0 + $0x88] sm:$0xff] }
   0x6   :  { %v2585_v25 = vpack.c.bf16 %v74_v12, %v70_v11  ;;  %v2593_v28 = vsub.f32 %v27_v8, %v74_v12  ;;  %v986_v30 = vand.u32 4294901760, %v29_v14  ;;  %v76_v31 = vand.u32 4294901760, %v32_v15  ;;  %v35_v32 = vld [vmem:[%s3409_s0 + $0x60] sm:$0xff]  ;;  %v37_v38 = vld [vmem:[%s3409_s0 + $0x70] sm:$0xff]  ;;  %v2622_v44 = vld [vmem:[%s3409_s0 + $0x98] sm:$0xff] }
   0x7   :  { %2205 = vmatprep.subr.bf16.mxu0 %v2564_v16  ;;  %2253 = vmatprep.subr.bf16.mxu1 %v2581_v23  ;;  %v80_v33 = vand.u32 4294901760, %v36_v20  ;;  %v988_v34 = vand.u32 4294901760, %v34_v21  ;;  %v992_v35 = vand.u32 4294901760, %v38_v22  ;;  %v78_v36 = vand.u32 4294901760, %v31_v27  ;;  %v39_v45 = vld [vmem:[%s3409_s0 + $0x80] sm:$0xff]  ;;  %v41_v50 = vld [vmem:[%s3409_s0 + $0x90] sm:$0xff] }
   0x8   :  { %2207 = vmatpush1.bf16.msra.mxu0 %v2585_v25  ;;  %v2606_v39 = vpack.c.bf16 %v986_v30, %v982_v29  ;;  %v2608_v40 = vsub.f32 %v25_v13, %v982_v29  ;;  %v2610_v41 = vsub.f32 %v29_v14, %v986_v30  ;;  %v2612_v42 = vsub.f32 %v32_v15, %v76_v31  ;;  %v15_v55 = vld [vmem:[%s3410_s1] sm:$0xff] }
   0x9   :  { %v2627_v46 = vpack.c.bf16 %v80_v33, %v76_v31  ;;  %v2629_v47 = vsub.f32 %v36_v20, %v80_v33  ;;  %v2631_v48 = vpack.c.bf16 %v992_v35, %v988_v34  ;;  %v2633_v49 = vsub.f32 %v34_v21, %v988_v34 }
   0xa   :  { %2255 = vmatpush1.bf16.msra.mxu1 %v2606_v39  ;;  %v2639_v51 = vsub.f32 %v38_v22, %v992_v35  ;;  %v82_v52 = vand.u32 4294901760, %v35_v32  ;;  %v2641_v53 = vsub.f32 %v31_v27, %v78_v36  ;;  %v990_v54 = vand.u32 4294901760, %v33_v37 }
   0xb   :  { %8 = vsyncpa [#allocation3], 0  ;;  %2209 = vmatprep.subr.bf16.mxu0 %v2627_v46  ;;  %2257 = vmatprep.subr.bf16.mxu1 %v2631_v48  ;;  %v994_v56 = vand.u32 4294901760, %v37_v38  ;;  %v2649_v57 = vand.u32 4294901760, %v2617_v43  ;;  %v2652_v58 = vand.u32 4294901760, %v2622_v44  ;;  %v2654_v59 = vand.u32 4294901760, %v39_v45 }
   0xc   :  { %v2656_v60 = vpack.c.bf16 %v82_v52, %v78_v36  ;;  %v2658_v61 = vsub.f32 %v35_v32, %v82_v52  ;;  %v2660_v62 = vsub.f32 %v33_v37, %v990_v54  ;;  %v2662_v63 = vand.u32 4294901760, %v41_v50  ;;  %v16_v34 = vld [vmem:[%s3410_s1 + $0x8] sm:$0xff]  ;;  %v17_v35 = vld [vmem:[%s3410_s1 + $0x10] sm:$0xff] }
   0xd   :  { %v2664_v0 = vpack.c.bf16 %v994_v56, %v990_v54  ;;  %v2666_v1 = vsub.f32 %v37_v38, %v994_v56  ;;  %v2669_v2 = vsub.f32 %v39_v45, %v2654_v59  ;;  %v45_v3 = vsel %vm43_vm0, %v15_v55, 0 }
   0xe   :  { %2211 = vmatpush1.bf16.msra.mxu0 %v2656_v60  ;;  %v2674_v4 = vsub.f32 %v41_v50, %v2662_v63  ;;  %v2676_v5 = vand.u32 4294901760, %v45_v3  ;;  %v3428_v6 = vand.u32 4294901760, %v2566_v17  ;;  %v3426_v7 = vand.u32 4294901760, %v2568_v18 }
   0xf   :  { %2259 = vmatpush1.bf16.msra.mxu1 %v2664_v0  ;;  %85 = vmatprep.subr.mxu0 %v2649_v57  ;;  %v3422_v8 = vand.u32 4294901760, %v2570_v19  ;;  %v3421_v10 = vand.u32 4294901760, %v2583_v24  ;;  %v3419_v11 = vand.u32 4294901760, %v2587_v26  ;;  %v3418_v12 = vand.u32 4294901760, %v2593_v28 }
  0x10   :  { %997 = vmatprep.subr.mxu1 %v2652_v58  ;;  %v2688_v13 = vsub.f32 %v45_v3, %v2676_v5  ;;  %v234_v14 = vsub.f32 %v2566_v17, %v3428_v6  ;;  %v246_v15 = vsub.f32 %v2568_v18, %v3426_v7  ;;  %v3417_v20 = vand.u32 4294901760, %v2608_v40 }
  0x11   :  { %v1146_v21 = vsub.f32 %v2570_v19, %v3422_v8  ;;  %v1158_v22 = vsub.f32 %v2583_v24, %v3421_v10  ;;  %v240_v27 = vsub.f32 %v2587_v26, %v3419_v11  ;;  %v252_v29 = vsub.f32 %v2593_v28, %v3418_v12 }
  0x12   :  { %87 = vmatpush1.msra.mxu0 %v2654_v59  ;;  %v2711_v30 = vand.u32 4294901760, %v2688_v13  ;;  %v235_v31 = vand.u32 4294901760, %v234_v14  ;;  %v247_v32 = vand.u32 4294901760, %v246_v15  ;;  %v1152_v33 = vsub.f32 %v2608_v40, %v3417_v20 }
  0x13   :  { %999 = vmatpush1.msra.mxu1 %v2662_v63  ;;  %v1147_v36 = vand.u32 4294901760, %v1146_v21  ;;  %v1159_v37 = vand.u32 4294901760, %v1158_v22  ;;  %v241_v38 = vand.u32 4294901760, %v240_v27  ;;  %v253_v45 = vand.u32 4294901760, %v252_v29  ;;  %v18_v21 = vld [vmem:[%s3410_s1 + $0x18] sm:$0xff] }
  0x14   :  { %3448 = vst [vmem:[#allocation5_spill] sm:$0xff] %v2711_v30  ;;  %v146_v50 = vsub.f32 %v2688_v13, %v2711_v30  ;;  %v2212_v52 = vpack.c.bf16 %v247_v32, %v235_v31  ;;  %v1153_v54 = vand.u32 4294901760, %v1152_v33  ;;  %v3416_v55 = vand.u32 4294901760, %v2610_v41 }
  0x15   :  { %v2260_v56 = vpack.c.bf16 %v1159_v37, %v1147_v36  ;;  %v2214_v3 = vpack.c.bf16 %v253_v45, %v241_v38  ;;  %v48_v14 = vsel %vm43_vm0, %v16_v34, 0  ;;  %v51_v15 = vsel %vm43_vm0, %v17_v35, 0 }
  0x16   :  { %v147_v22 = vand.u32 4294901760, %v146_v50  ;;  %2213 = vmatprep.subr.bf16.mxu0 %v2212_v52  ;;  %v1164_v27 = vsub.f32 %v2610_v41, %v3416_v55  ;;  %v2734_v29 = vand.u32 4294901760, %v48_v14  ;;  %v2736_v31 = vand.u32 4294901760, %v51_v15 }
  0x17   :  { %2261 = vmatprep.subr.bf16.mxu1 %v2260_v56  ;;  %v3414_v32 = vand.u32 4294901760, %v2612_v42  ;;  %v3413_v33 = vand.u32 4294901760, %v2629_v47  ;;  %v3415_v34 = vand.u32 4294901760, %v2633_v49  ;;  %v3420_v35 = vand.u32 4294901760, %v2639_v51 }
  0x18   :  { %148 = vmatmul.mubr.f32.vlgmr.msra.gmra.mrb[0].mxu0 %v147_v22  ;;  %1060 = vmatmul.mubr.f32.vlgmr.msra.gmra.mrb[0].mxu1 %v147_v22  ;;  %v1165_v36 = vand.u32 4294901760, %v1164_v27  ;;  %v2743_v37 = vsub.f32 %v48_v14, %v2734_v29  ;;  %v2746_v38 = vsub.f32 %v51_v15, %v2736_v31  ;;  %v54_v45 = vsel %vm43_vm0, %v18_v21, 0 }
  0x19   :  { %2215 = vmatpush1.bf16.msra.mxu0 %v2214_v3  ;;  %153 = vmatprep.mubr.f32.mxu0 %v3429_v9  ;;  %v258_v50 = vsub.f32 %v2612_v42, %v3414_v32  ;;  %v270_v52 = vsub.f32 %v2629_v47, %v3413_v33  ;;  %v1170_v56 = vsub.f32 %v2633_v49, %v3415_v34  ;;  %v2759_v14 = vand.u32 4294901760, %v54_v45 }
  0x1a   :  { %v2262_v15 = vpack.c.bf16 %v1165_v36, %v1153_v54  ;;  %1065 = vmatprep.mubr.f32.mxu1 %v3429_v9  ;;  %v2763_v3 = vand.u32 4294901760, %v2743_v37  ;;  %v2766_v21 = vand.u32 4294901760, %v2746_v38  ;;  %v1182_v22 = vsub.f32 %v2639_v51, %v3420_v35 }
  0x1b   :  { %v259_v27 = vand.u32 4294901760, %v258_v50  ;;  %v271_v33 = vand.u32 4294901760, %v270_v52  ;;  %v1171_v32 = vand.u32 4294901760, %v1170_v56  ;;  %v2772_v34 = vsub.f32 %v54_v45, %v2759_v14  ;;  %v19_v45 = vld [vmem:[%s3410_s1 + $0x20] sm:$0xff]  ;;  %v20_v56 = vld [vmem:[%s3410_s1 + $0x28] sm:$0xff] }
  0x1c   :  { %3449 = vst [vmem:[#allocation6_spill] sm:$0xff] %v2763_v3  ;;  %3450 = vst [vmem:[#allocation7_spill] sm:$0xff] %v2766_v21  ;;  %2263 = vmatpush1.bf16.msra.mxu1 %v2262_v15  ;;  %v157_v54 = vsub.f32 %v2743_v37, %v2763_v3  ;;  %v168_v36 = vsub.f32 %v2746_v38, %v2766_v21  ;;  %v1183_v55 = vand.u32 4294901760, %v1182_v22  ;;  %v3424_v20 = vand.u32 4294901760, %v2641_v53 }
  0x1d   :  { %v2216_v12 = vpack.c.bf16 %v271_v33, %v259_v27  ;;  %v2780_v11 = vand.u32 4294901760, %v2772_v34  ;;  %v3423_v50 = vand.u32 4294901760, %v2658_v61  ;;  %v3425_v52 = vand.u32 4294901760, %v2660_v62 }
  0x1e   :  { %v158_v15 = vand.u32 4294901760, %v157_v54  ;;  %v169_v22 = vand.u32 4294901760, %v168_v36  ;;  %v2264_v35 = vpack.c.bf16 %v1183_v55, %v1171_v32  ;;  %v264_v33 = vsub.f32 %v2641_v53, %v3424_v20 }
  0x1f   :  { %3451 = vst [vmem:[#allocation8_spill] sm:$0xff] %v2780_v11  ;;  %2217 = vmatprep.subr.bf16.mxu0 %v2216_v12  ;;  %v179_v27 = vsub.f32 %v2772_v34, %v2780_v11  ;;  %v276_v10 = vsub.f32 %v2658_v61, %v3423_v50  ;;  %v1176_v8 = vsub.f32 %v2660_v62, %v3425_v52  ;;  %v3427_v54 = vand.u32 4294901760, %v2666_v1 }
  0x20   :  { %159 = vmatmul.mubr.f32.gmra.mrb[2].mxu0 %v158_v15  ;;  %1071 = vmatmul.mubr.f32.gmra.mrb[2].mxu1 %v158_v15  ;;  %v265_v55 = vand.u32 4294901760, %v264_v33  ;;  %v57_v32 = vsel %vm43_vm0, %v19_v45, 0  ;;  %v60_v12 = vsel %vm43_vm0, %v20_v56, 0  ;;  %v2806_v36 = vsub.f32 %v2617_v43, %v2649_v57 }
  0x21   :  { %164 = vmatprep.mubr.f32.mxu0 %v3429_v9  ;;  %1076 = vmatprep.mubr.f32.mxu1 %v3429_v9  ;;  %v180_v50 = vand.u32 4294901760, %v179_v27  ;;  %v277_v20 = vand.u32 4294901760, %v276_v10  ;;  %v1177_v52 = vand.u32 4294901760, %v1176_v8  ;;  %v1188_v15 = vsub.f32 %v2666_v1, %v3427_v54  ;;  %v21_v10 = vld [vmem:[%s3410_s1 + $0x30] sm:$0xff] }
  0x22   :  { %2265 = vmatprep.subr.bf16.mxu1 %v2264_v35  ;;  %v2813_v33 = vand.u32 4294901760, %v57_v32  ;;  %v2815_v45 = vand.u32 4294901760, %v60_v12  ;;  %v3431_v56 = vand.u32 4294901760, %v2806_v36  ;;  %v2820_v43 = vsub.f32 %v2622_v44, %v2652_v58 }
  0x23   :  { %v2218_v8 = vpack.c.bf16 %v277_v20, %v265_v55  ;;  %v1189_v27 = vand.u32 4294901760, %v1188_v15  ;;  %v3434_v7 = vand.u32 4294901760, %v2669_v2  ;;  %v3439_v35 = vand.u32 4294901760, %v2674_v4  ;;  %v22_v20 = vld [vmem:[%s3410_s1 + $0x38] sm:$0xff] }
  0x24   :  { %170 = vmatmul.mubr.f32.gmra.mrb[4].mxu0 %v169_v22  ;;  %1082 = vmatmul.mubr.f32.gmra.mrb[4].mxu1 %v169_v22  ;;  %v2828_v54 = vsub.f32 %v57_v32, %v2813_v33  ;;  %v2831_v6 = vsub.f32 %v60_v12, %v2815_v45  ;;  %v282_v44 = vsub.f32 %v2806_v36, %v3431_v56  ;;  %v3452_v55 = vmov 0.0  }
  0x25   :  { %175 = vmatprep.mubr.f32.mxu0 %v3452_v55  ;;  %1087 = vmatprep.mubr.f32.mxu1 %v3452_v55  ;;  %v2266_v22 = vpack.c.bf16 %v1189_v27, %v1177_v52  ;;  %v288_v32 = vsub.f32 %v2669_v2, %v3434_v7  ;;  %v1200_v12 = vsub.f32 %v2674_v4, %v3439_v35  ;;  %v63_v15 = vsel %vm43_vm0, %v21_v10, 0 }
  0x26   :  { %2219 = vmatpush1.bf16.msra.mxu0 %v2218_v8  ;;  %v2850_v56 = vand.u32 4294901760, %v2828_v54  ;;  %v2853_v9 = vand.u32 4294901760, %v2831_v6  ;;  %v283_v11 = vand.u32 4294901760, %v282_v44  ;;  %v3455_v52 = vand.u32 4294901760, %v2820_v43 }
  0x27   :  { %2267 = vmatpush1.bf16.msra.mxu1 %v2266_v22  ;;  %v289_v7 = vand.u32 4294901760, %v288_v32  ;;  %v1201_v21 = vand.u32 4294901760, %v1200_v12  ;;  %v2858_v3 = vand.u32 4294901760, %v63_v15  ;;  %v66_v35 = vsel %vm43_vm0, %v22_v20, 0 }
  0x28   :  { %3453 = vst [vmem:[#allocation9_spill] sm:$0xff] %v2850_v56  ;;  %3454 = vst [vmem:[#allocation10_spill] sm:$0xff] %v2853_v9  ;;  %v1194_v27 = vsub.f32 %v2820_v43, %v3455_v52  ;;  %181 = vmatmul.mubr.f32.gmra.mrb[6].mxu0 %v180_v50  ;;  %1093 = vmatmul.mubr.f32.gmra.mrb[6].mxu1 %v180_v50  ;;  %v190_v10 = vsub.f32 %v2828_v54, %v2850_v56  ;;  %v2865_v30 = vand.u32 4294901760, %v66_v35 }
  0x29   :  { %v201_v8 = vsub.f32 %v2831_v6, %v2853_v9  ;;  %186 = vmatprep.mubr.f32.mxu0 %v3452_v55  ;;  %1098 = vmatprep.mubr.f32.mxu1 %v3452_v55  ;;  %v2870_v22 = vsub.f32 %v63_v15, %v2858_v3  ;;  %v2220_v20 = vpack.c.bf16 %v2568_v18, %v2566_v17 }
  0x2a   :  { %v1195_v44 = vand.u32 4294901760, %v1194_v27  ;;  %v191_v32 = vand.u32 4294901760, %v190_v10  ;;  %284 = vmatprep.subr.mxu0 %v283_v11  ;;  %v2873_v50 = vsub.f32 %v66_v35, %v2865_v30  ;;  %v2268_v12 = vpack.c.bf16 %v2583_v24, %v2570_v19 }
  0x2b   :  { %290 = vmatpush1.msra.mxu0 %v289_v7  ;;  %v2880_v52 = vand.u32 4294901760, %v2870_v22  ;;  %v202_v15 = vand.u32 4294901760, %v201_v8  ;;  %v3457_v35 = vand.u32 4294901760, %v2566_v17  ;;  %v3458_v27 = vand.u32 4294901760, %v2568_v18 }
  0x2c   :  { %1196 = vmatprep.subr.mxu1 %v1195_v44  ;;  %192 = vmatmul.mubr.f32.gmra.mrb[8].mxu0 %v191_v32  ;;  %v2883_v11 = vand.u32 4294901760, %v2873_v50  ;;  %v3460_v8 = vand.u32 4294901760, %v2583_v24  ;;  %v3462_v17 = vand.u32 4294901760, %v2593_v28  ;;  %v3466_v24 = vand.u32 4294901760, %v2629_v47 }
  0x2d   :  { %1202 = vmatpush1.msra.mxu1 %v1201_v21  ;;  %3456 = vst [vmem:[#allocation11_spill] sm:$0xff] %v2880_v52  ;;  %v2889_v10 = vpack.c.bf16 %v3458_v27, %v3457_v35  ;;  %197 = vmatprep.mubr.f32.mxu0 %v3452_v55  ;;  %v212_v7 = vsub.f32 %v2870_v22, %v2880_v52  ;;  %v3459_v21 = vand.u32 4294901760, %v2570_v19  ;;  %v3463_v35 = vand.u32 4294901760, %v2608_v40 }
  0x2e   :  { %1104 = vmatmul.mubr.f32.gmra.mrb[8].mxu1 %v191_v32  ;;  %v3461_v32 = vand.u32 4294901760, %v2587_v26  ;;  %2221 = vmatprep.subr.bf16.mxu0 %v2220_v20  ;;  %v3464_v27 = vand.u32 4294901760, %v2610_v41  ;;  %v3465_v19 = vand.u32 4294901760, %v2612_v42  ;;  %v3468_v52 = vand.u32 4294901760, %v2639_v51 }
  0x2f   :  { %1109 = vmatprep.mubr.f32.mxu1 %v3452_v55  ;;  %v2899_v44 = vpack.c.bf16 %v3460_v8, %v3459_v21  ;;  %2269 = vmatprep.subr.bf16.mxu1 %v2268_v12  ;;  %v3467_v8 = vand.u32 4294901760, %v2633_v49  ;;  %v3469_v20 = vand.u32 4294901760, %v2641_v53  ;;  %v3470_v12 = vand.u32 4294901760, %v2658_v61 }
  0x30   :  { %v2905_v18 = vpack.c.bf16 %v3462_v17, %v3461_v32  ;;  %v2911_v9 = vpack.c.bf16 %v3464_v27, %v3463_v35  ;;  %v2917_v21 = vpack.c.bf16 %v3466_v24, %v3465_v19  ;;  %v3471_v35 = vand.u32 4294901760, %v2660_v62  ;;  %203 = vmatmul.mubr.f32.gmra.mrb[10].mxu0 %v202_v15 }
  0x31   :  { %v2923_v32 = vpack.c.bf16 %v3468_v52, %v3467_v8  ;;  %v2929_v17 = vpack.c.bf16 %v3470_v12, %v3469_v20  ;;  %v3472_v27 = vand.u32 4294901760, %v2666_v1  ;;  %v213_v19 = vand.u32 4294901760, %v212_v7  ;;  %208 = vmatprep.mubr.f32.mxu0 %v3452_v55 }
  0x32   :  { %1115 = vmatmul.mubr.f32.gmra.mrb[10].mxu1 %v202_v15  ;;  %v223_v24 = vsub.f32 %v2873_v50, %v2883_v11  ;;  %v2222_v15 = vpack.c.bf16 %v2593_v28, %v2587_v26  ;;  %v2270_v7 = vpack.c.bf16 %v2610_v41, %v2608_v40  ;;  %v2224_v8 = vpack.c.bf16 %v2629_v47, %v2612_v42  ;;  %v2996_v40 = vld [vmem:[%s3411_s2 + $0x10] sm:$0xff]  ;;  %v3004_v42 = vld [vmem:[%s3411_s2] sm:$0xff] }
  0x33   :  { %v2935_v56 = vpack.c.bf16 %v3472_v27, %v3471_v35  ;;  %1120 = vmatprep.mubr.f32.mxu1 %v3452_v55  ;;  %v2272_v20 = vpack.c.bf16 %v2639_v51, %v2633_v49  ;;  %v2226_v26 = vpack.c.bf16 %v2658_v61, %v2641_v53  ;;  %v2274_v28 = vpack.c.bf16 %v2666_v1, %v2660_v62  ;;  %v3036_v49 = vld [vmem:[%s3411_s2 + $0x18] sm:$0xff]  ;;  %v3045_v51 = vld [vmem:[%s3411_s2 + $0x8] sm:$0xff]  ;;  %v3473_v62 = vld [vmem:[#allocation5_spill] sm:$0xff] }
  0x34   :  { %214 = vmatmul.mubr.f32.gmra.mrb[12].mxu0 %v213_v19  ;;  %v224_v52 = vand.u32 4294901760, %v223_v24  ;;  %v2510_v41 = vmov 1   ;;  %v2511_v47 = vmov 2   ;;  %v2512_v53 = vmov 0   ;;  %v3474_v1 = vld [vmem:[#allocation6_spill] sm:$0xff] }
  0x35   :  { %219 = vmatprep.mubr.f32.mxu0 %v3452_v55  ;;  %2466 = vset.pattern.permute.xlu1 %v2510_v41  ;;  %v2513_v61 = vmov 3  }
  0x36   :  { %1126 = vmatmul.mubr.f32.gmra.mrb[12].mxu1 %v213_v19  ;;  %2469 = vset.pattern.permute.xlu0 %v2511_v47 }
  0x37   :  { %1131 = vmatprep.mubr.f32.mxu1 %v3452_v55  ;;  %1911 = vperm.xlu1 %2466, %v2996_v40  }
  0x38   :  { %225 = vmatmul.mubr.f32.gmra.mrb[14].mxu0 %v224_v52  ;;  %2000 = vperm.xlu0 %2469, %v3004_v42  }
  0x39   :  { %345 = vmatprep.mubr.f32.mxu0 %v3452_v55 }
  0x3a   :  { %1137 = vmatmul.mubr.f32.gmra.mrb[14].mxu1 %v224_v52 }
  0x3b   :  { %1257 = vmatprep.mubr.f32.mxu1 %v3452_v55  ;;  %1916 = vperm.xlu1 %2466, %v3036_v49  }
  0x3c   :  { %347 = vmatmul.mubr.f32.vlgmr.msra.gmra.mrb[0].mxu0 %v2676_v5  ;;  %2004 = vperm.xlu0 %2469, %v3045_v51  }
  0x3d   :  { %2223 = vmatpush1.bf16.msra.mxu0 %v2222_v15  ;;  %352 = vmatprep.mubr.f32.mxu0 %v3452_v55 }
  0x3e   :  { %1259 = vmatmul.mubr.f32.vlgmr.msra.gmra.mrb[0].mxu1 %v2676_v5  ;;  %2225 = vmatprep.subr.bf16.mxu0 %v2224_v8 }
  0x3f   :  { %2271 = vmatpush1.bf16.msra.mxu1 %v2270_v7  ;;  %1264 = vmatprep.mubr.f32.mxu1 %v3452_v55 }
  0x40   :  { %2273 = vmatprep.subr.bf16.mxu1 %v2272_v20  ;;  %354 = vmatmul.mubr.f32.gmra.mrb[2].mxu0 %v2734_v29 }
  0x41   :  { %359 = vmatprep.mubr.f32.mxu0 %v3452_v55  ;;  %2227 = vmatpush1.bf16.msra.mxu0 %v2226_v26 }
  0x42   :  { %1266 = vmatmul.mubr.f32.gmra.mrb[2].mxu1 %v2734_v29  ;;  %428 = vmatprep.subr.mxu0 %v2806_v36 }
  0x43   :  { %1271 = vmatprep.mubr.f32.mxu1 %v3452_v55  ;;  %2275 = vmatpush1.bf16.msra.mxu1 %v2274_v28 }
  0x44   :  { %1340 = vmatprep.subr.mxu1 %v2820_v43  ;;  %361 = vmatmul.mubr.f32.gmra.mrb[4].mxu0 %v2736_v31 }
  0x45   :  { %366 = vmatprep.mubr.f32.mxu0 %v3452_v55  ;;  %431 = vmatpush1.msra.mxu0 %v2669_v2 }
  0x46   :  { %1273 = vmatmul.mubr.f32.gmra.mrb[4].mxu1 %v2736_v31  ;;  %2229 = vmatprep.subr.bf16.mxu0 %v2564_v16 }
  0x47   :  { %1278 = vmatprep.mubr.f32.mxu1 %v3452_v55  ;;  %1343 = vmatpush1.msra.mxu1 %v2674_v4 }
  0x48   :  { %2277 = vmatprep.subr.bf16.mxu1 %v2581_v23  ;;  %368 = vmatmul.mubr.f32.gmra.mrb[6].mxu0 %v2759_v14 }
  0x49   :  { %373 = vmatprep.mubr.f32.mxu0 %v3452_v55  ;;  %2467 = vset.pattern.permute.xlu1 %v2512_v53 }
  0x4a   :  { %1280 = vmatmul.mubr.f32.gmra.mrb[6].mxu1 %v2759_v14  ;;  %2012 = vperm.xlu0 %2469, %v3036_v49  }
  0x4b   :  { %1285 = vmatprep.mubr.f32.mxu1 %v3452_v55  ;;  %1940 = vperm.xlu1 %2467, %v3045_v51  }
  0x4c   :  { %375 = vmatmul.mubr.f32.gmra.mrb[8].mxu0 %v2813_v33 }
  0x4d   :  { %380 = vmatprep.mubr.f32.mxu0 %v3452_v55 }
  0x4e   :  { %1287 = vmatmul.mubr.f32.gmra.mrb[8].mxu1 %v2813_v33  ;;  %2472 = vset.pattern.permute.xlu0 %v2512_v53 }
  0x4f   :  { %1292 = vmatprep.mubr.f32.mxu1 %v3452_v55  ;;  %2468 = vset.pattern.permute.xlu1 %v2513_v61 }
  0x50   :  { %382 = vmatmul.mubr.f32.gmra.mrb[10].mxu0 %v2815_v45  ;;  %1936 = vperm.xlu0 %2472, %v3004_v42  }
  0x51   :  { %387 = vmatprep.mubr.f32.mxu0 %v3452_v55  ;;  %1968 = vperm.xlu1 %2468, %v3004_v42  }
  0x52   :  { %1294 = vmatmul.mubr.f32.gmra.mrb[10].mxu1 %v2815_v45 }
  0x53   :  { %1299 = vmatprep.mubr.f32.mxu1 %v3452_v55 }
  0x54   :  { %389 = vmatmul.mubr.f32.gmra.mrb[12].mxu0 %v2858_v3  ;;  %1944 = vperm.xlu0 %2472, %v2996_v40  }
  0x55   :  { %394 = vmatprep.mubr.f32.mxu0 %v3452_v55  ;;  %1972 = vperm.xlu1 %2468, %v3045_v51  }
  0x56   :  { %1301 = vmatmul.mubr.f32.gmra.mrb[12].mxu1 %v2858_v3 }
  0x57   :  { %1306 = vmatprep.mubr.f32.mxu1 %v3452_v55 }
  0x58   :  { %396 = vmatmul.mubr.f32.gmra.mrb[14].mxu0 %v2865_v30  ;;  %1948 = vperm.xlu0 %2472, %v3036_v49  }
  0x59   :  { %486 = vmatprep.mubr.f32.mxu0 %v3452_v55  ;;  %1976 = vperm.xlu1 %2468, %v2996_v40  }
  0x5a   :  { %1308 = vmatmul.mubr.f32.gmra.mrb[14].mxu1 %v2865_v30 }
  0x5b   :  { %1398 = vmatprep.mubr.f32.mxu1 %v3452_v55 }
  0x5c   :  { %489 = vmatmul.mubr.f32.vlgmr.msra.gmra.mrb[0].mxu0 %v2688_v13  ;;  %2475 = vset.pattern.permute.xlu0 %v2510_v41 }
  0x5d   :  { %2231 = vmatpush1.bf16.msra.mxu0 %v2585_v25  ;;  %494 = vmatprep.mubr.f32.mxu0 %v3452_v55 }
  0x5e   :  { %1401 = vmatmul.mubr.f32.vlgmr.msra.gmra.mrb[0].mxu1 %v2688_v13  ;;  %2233 = vmatprep.subr.bf16.mxu0 %v2627_v46  ;;  %v3477_v13 = vld [vmem:[#allocation7_spill] sm:$0xff] }
  0x5f   :  { %2279 = vmatpush1.bf16.msra.mxu1 %v2606_v39  ;;  %1406 = vmatprep.mubr.f32.mxu1 %v3452_v55 }
  0x60   :  { %2281 = vmatprep.subr.bf16.mxu1 %v2631_v48  ;;  %497 = vmatmul.mubr.f32.gmra.mrb[2].mxu0 %v2743_v37 }
  0x61   :  { %502 = vmatprep.mubr.f32.mxu0 %v3452_v55  ;;  %2235 = vmatpush1.bf16.msra.mxu0 %v2656_v60 }
  0x62   :  { %1409 = vmatmul.mubr.f32.gmra.mrb[2].mxu1 %v2743_v37  ;;  %568 = vmatprep.subr.mxu0 %v2649_v57  ;;  %v3479_v37 = vand.u32 4294901760, %v2674_v4  ;;  %v3483_v4 = vld [vmem:[#allocation11_spill] sm:$0xff] }
  0x63   :  { %1414 = vmatprep.mubr.f32.mxu1 %v3452_v55  ;;  %2283 = vmatpush1.bf16.msra.mxu1 %v2664_v0 }
  0x64   :  { %1480 = vmatprep.subr.mxu1 %v2652_v58  ;;  %505 = vmatmul.mubr.f32.gmra.mrb[4].mxu0 %v2746_v38 }
  0x65   :  { %510 = vmatprep.mubr.f32.mxu0 %v3452_v55  ;;  %570 = vmatpush1.msra.mxu0 %v2654_v59 }
  0x66   :  { %1417 = vmatmul.mubr.f32.gmra.mrb[4].mxu1 %v2746_v38  ;;  %2237 = vmatprep.subr.bf16.mxu0 %v2889_v10  ;;  %v3480_v38 = vld [vmem:[#allocation8_spill] sm:$0xff] }
  0x67   :  { %1422 = vmatprep.mubr.f32.mxu1 %v3452_v55  ;;  %1482 = vmatpush1.msra.mxu1 %v2662_v63 }
  0x68   :  { %2285 = vmatprep.subr.bf16.mxu1 %v2899_v44  ;;  %513 = vmatmul.mubr.f32.gmra.mrb[6].mxu0 %v2772_v34 }
  0x69   :  { %518 = vmatprep.mubr.f32.mxu0 %v3452_v55  ;;  %1901 = vperm.xlu0 %2475, %v3004_v42  }
  0x6a   :  { %1425 = vmatmul.mubr.f32.gmra.mrb[6].mxu1 %v2772_v34  ;;  %v3478_v34 = vand.u32 4294901760, %v2669_v2  ;;  %v3481_v2 = vld [vmem:[#allocation9_spill] sm:$0xff]  ;;  %2470 = vset.pattern.permute.xlu1 %v2511_v47 }
  0x6b   :  { %1430 = vmatprep.mubr.f32.mxu1 %v3452_v55  ;;  %2008 = vperm.xlu1 %2470, %v2996_v40  }
  0x6c   :  { %521 = vmatmul.mubr.f32.gmra.mrb[8].mxu0 %v2828_v54 }
  0x6d   :  { %526 = vmatprep.mubr.f32.mxu0 %v3452_v55  ;;  %1906 = vperm.xlu0 %2475, %v3045_v51  }
  0x6e   :  { %1433 = vmatmul.mubr.f32.gmra.mrb[8].mxu1 %v2828_v54  ;;  %v1896_v54 = vld [vmem:[%s3411_s2 + $0x20] sm:$0xff] }
  0x6f   :  { %1438 = vmatprep.mubr.f32.mxu1 %v3452_v55  ;;  %2471 = vset.pattern.permute.xlu1 %v2513_v61 }
  0x70   :  { %529 = vmatmul.mubr.f32.gmra.mrb[10].mxu0 %v2831_v6  ;;  %1980 = vperm.xlu1 %2471, %v3036_v49  }
  0x71   :  { %534 = vmatprep.mubr.f32.mxu0 %v3452_v55 }
  0x72   :  { %1441 = vmatmul.mubr.f32.gmra.mrb[10].mxu1 %v2831_v6  ;;  %v3476_v6 = vand.u32 4294901760, %v2820_v43 }
  0x73   :  { %1446 = vmatprep.mubr.f32.mxu1 %v3452_v55 }
  0x74   :  { %537 = vmatmul.mubr.f32.gmra.mrb[12].mxu0 %v2870_v22  ;;  %2098 = vperm.xlu1 %2471, %v1896_v54  }
  0x75   :  { %542 = vmatprep.mubr.f32.mxu0 %v3452_v55 }
  0x76   :  { %1449 = vmatmul.mubr.f32.gmra.mrb[12].mxu1 %v2870_v22 }
  0x77   :  { %1454 = vmatprep.mubr.f32.mxu1 %v3452_v55 }
  0x78   :  { %545 = vmatmul.mubr.f32.gmra.mrb[14].mxu0 %v2873_v50  ;;  %2473 = vset.pattern.permute.xlu1 %v2510_v41 }
  0x79   :  { %625 = vmatprep.mubr.f32.mxu0 %v3452_v55  ;;  %2065 = vperm.xlu1 %2473, %v1896_v54  }
  0x7a   :  { %1457 = vmatmul.mubr.f32.gmra.mrb[14].mxu1 %v2873_v50 }
  0x7b   :  { %1537 = vmatprep.mubr.f32.mxu1 %v3452_v55 }
  0x7c   :  { %629 = vmatmul.mubr.f32.vlgmr.msra.gmra.mrb[0].mxu0 %v3473_v62 }
  0x7d   :  { %2239 = vmatpush1.bf16.msra.mxu0 %v2905_v18  ;;  %634 = vmatprep.mubr.f32.mxu0 %v3452_v55 }
  0x7e   :  { %1541 = vmatmul.mubr.f32.vlgmr.msra.gmra.mrb[0].mxu1 %v3473_v62  ;;  %2241 = vmatprep.subr.bf16.mxu0 %v2917_v21 }
  0x7f   :  { %2287 = vmatpush1.bf16.msra.mxu1 %v2911_v9  ;;  %1546 = vmatprep.mubr.f32.mxu1 %v3452_v55  ;;  %v3475_v9 = vand.u32 4294901760, %v2806_v36  ;;  %v3140_v36 = vld [vmem:[%s3411_s2 + $0x30] sm:$0xff] }
  0x80   :  { %2289 = vmatprep.subr.bf16.mxu1 %v2923_v32  ;;  %638 = vmatmul.mubr.f32.gmra.mrb[2].mxu0 %v3474_v1 }
  0x81   :  { %643 = vmatprep.mubr.f32.mxu0 %v3452_v55  ;;  %2243 = vmatpush1.bf16.msra.mxu0 %v2929_v17 }
  0x82   :  { %1550 = vmatmul.mubr.f32.gmra.mrb[2].mxu1 %v3474_v1  ;;  %733 = vmatprep.subr.mxu0 %v3475_v9 }
  0x83   :  { %1555 = vmatprep.mubr.f32.mxu1 %v3452_v55  ;;  %2291 = vmatpush1.bf16.msra.mxu1 %v2935_v56 }
  0x84   :  { %1645 = vmatprep.subr.mxu1 %v3476_v6  ;;  %647 = vmatmul.mubr.f32.gmra.mrb[4].mxu0 %v3477_v13 }
  0x85   :  { %652 = vmatprep.mubr.f32.mxu0 %v3452_v55  ;;  %737 = vmatpush1.msra.mxu0 %v3478_v34 }
  0x86   :  { %1559 = vmatmul.mubr.f32.gmra.mrb[4].mxu1 %v3477_v13  ;;  %2245 = vmatprep.subr.bf16.mxu0 %v2564_v16  ;;  %v3482_v16 = vld [vmem:[#allocation10_spill] sm:$0xff] }
  0x87   :  { %1564 = vmatprep.mubr.f32.mxu1 %v3452_v55  ;;  %1649 = vmatpush1.msra.mxu1 %v3479_v37 }
  0x88   :  { %2293 = vmatprep.subr.bf16.mxu1 %v2581_v23  ;;  %656 = vmatmul.mubr.f32.gmra.mrb[6].mxu0 %v3480_v38  ;;  %v3124_v23 = vld [vmem:[%s3411_s2 + $0x28] sm:$0xff]  ;;  %s2514_s2 = smov [#allocation2]  }
  0x89   :  { %661 = vmatprep.mubr.f32.mxu0 %v3452_v55  ;;  %2070 = vperm.xlu0 %2475, %v3124_v23   ;;  %s2196_s26 = sshll.u32 %s2514_s2, 4  ;;  %s2197_s26 = int_to_ptr.vmem [resolvable:$true] %s2196_s26 }
  0x8a   :  { %1568 = vmatmul.mubr.f32.gmra.mrb[6].mxu1 %v3480_v38  ;;  %2474 = vset.pattern.permute.xlu1 %v2511_v47  ;;  %s2485_s0 = scalar_lea.vmem %s2197_s26, 512  ;;  %p2490_p1 = scmp.lt.s32.totalorder %s2197_s26, %s2197_s26 }
  0x8b   :  { %1573 = vmatprep.mubr.f32.mxu1 %v3452_v55  ;;  %2114 = vperm.xlu1 %2474, %v1896_v54   ;;  %p2486_p0 = scmp.ne.s32.totalorder %s2197_s26, %s2485_s0  ;;  %p2491_p2 = scmp.lt.s32.totalorder %s2485_s0, %s2485_s0 }
  0x8c   :  { %665 = vmatmul.mubr.f32.gmra.mrb[8].mxu0 %v3481_v2 }
  0x8d   :  { %670 = vmatprep.mubr.f32.mxu0 %v3452_v55  ;;  %2480 = vset.pattern.permute.xlu0 %v2513_v61  ;;  %p2492_p3 = por %p2491_p2, %p2490_p1 }
  0x8e   :  { %1577 = vmatmul.mubr.f32.gmra.mrb[8].mxu1 %v3481_v2  ;;  %2163 = vperm.xlu0 %2480, %v3140_v36  }
  0x8f   :  { %1582 = vmatprep.mubr.f32.mxu1 %v3452_v55  ;;  %2476 = vset.pattern.permute.xlu1 %v2512_v53  ;;  %p2493_p4 = pnand %p2492_p3, %p2486_p0 }
  0x90   :  { %674 = vmatmul.mubr.f32.gmra.mrb[10].mxu0 %v3482_v16  ;;  %2082 = vperm.xlu1 %2476, %v1896_v54  }
  0x91   :  { %679 = vmatprep.mubr.f32.mxu0 %v3452_v55 }
  0x92   :  { %1586 = vmatmul.mubr.f32.gmra.mrb[10].mxu1 %v3482_v16  ;;  %2483 = vset.pattern.permute.xlu0 %v2512_v53 }
  0x93   :  { %1591 = vmatprep.mubr.f32.mxu1 %v3452_v55  ;;  %2155 = vperm.xlu0 %2483, %v3140_v36  }
  0x94   :  { %683 = vmatmul.mubr.f32.gmra.mrb[12].mxu0 %v3483_v4  ;;  %2477 = vset.pattern.permute.xlu1 %v2513_v61 }
  0x95   :  { %688 = vmatprep.mubr.f32.mxu0 %v3452_v55  ;;  %2102 = vperm.xlu1 %2477, %v3124_v23  }
  0x96   :  { %1595 = vmatmul.mubr.f32.gmra.mrb[12].mxu1 %v3483_v4 }
  0x97   :  { %1600 = vmatprep.mubr.f32.mxu1 %v3452_v55  ;;  %2484 = vset.pattern.permute.xlu0 %v2511_v47 }
  0x98   :  { %692 = vmatmul.mubr.f32.gmra.mrb[14].mxu0 %v2883_v11 }
  0x99   :  { %792 = vmatprep.mubr.f32.mxu0 %v3452_v55  ;;  %2478 = vset.pattern.permute.xlu1 %v2511_v47 }
  0x9a   :  { %1604 = vmatmul.mubr.f32.gmra.mrb[14].mxu1 %v2883_v11  ;;  %2118 = vperm.xlu1 %2478, %v3124_v23  }
  0x9b   :  { %1704 = vmatprep.mubr.f32.mxu1 %v3452_v55 }
  0x9c   :  { %794 = vmatmul.mubr.f32.vlgmr.msra.gmra.mrb[0].mxu0 %v2676_v5 }
  0x9d   :  { %2247 = vmatpush1.bf16.msra.mxu0 %v2585_v25  ;;  %799 = vmatprep.mubr.f32.mxu0 %v3452_v55 }
  0x9e   :  { %1706 = vmatmul.mubr.f32.vlgmr.msra.gmra.mrb[0].mxu1 %v2676_v5  ;;  %2249 = vmatprep.subr.bf16.mxu0 %v2627_v46 }
  0x9f   :  { %2295 = vmatpush1.bf16.msra.mxu1 %v2606_v39  ;;  %1711 = vmatprep.mubr.f32.mxu1 %v3452_v55 }
  0xa0   :  { %2297 = vmatprep.subr.bf16.mxu1 %v2631_v48  ;;  %801 = vmatmul.mubr.f32.gmra.mrb[2].mxu0 %v2734_v29 }
  0xa1   :  { %806 = vmatprep.mubr.f32.mxu0 %v3452_v55  ;;  %2251 = vmatpush1.bf16.msra.mxu0 %v2656_v60 }
  0xa2   :  { %1713 = vmatmul.mubr.f32.gmra.mrb[2].mxu1 %v2734_v29  ;;  %866 = vmatprep.subr.mxu0 %v2649_v57 }
  0xa3   :  { %1718 = vmatprep.mubr.f32.mxu1 %v3452_v55  ;;  %2299 = vmatpush1.bf16.msra.mxu1 %v2664_v0 }
  0xa4   :  { %1778 = vmatprep.subr.mxu1 %v2652_v58  ;;  %808 = vmatmul.mubr.f32.gmra.mrb[4].mxu0 %v2736_v31 }
  0xa5   :  { %813 = vmatprep.mubr.f32.mxu0 %v3452_v55  ;;  %868 = vmatpush1.msra.mxu0 %v2654_v59 }
  0xa6   :  { %1720 = vmatmul.mubr.f32.gmra.mrb[4].mxu1 %v2736_v31  ;;  %2479 = vset.pattern.permute.xlu1 %v2512_v53 }
  0xa7   :  { %1725 = vmatprep.mubr.f32.mxu1 %v3452_v55  ;;  %1780 = vmatpush1.msra.mxu1 %v2662_v63 }
  0xa8   :  { %815 = vmatmul.mubr.f32.gmra.mrb[6].mxu0 %v2759_v14  ;;  %2086 = vperm.xlu1 %2479, %v3124_v23  }
  0xa9   :  { %820 = vmatprep.mubr.f32.mxu0 %v3452_v55 }
  0xaa   :  { %1727 = vmatmul.mubr.f32.gmra.mrb[6].mxu1 %v2759_v14 }
  0xab   :  { %1732 = vmatprep.mubr.f32.mxu1 %v3452_v55 }
  0xac   :  { %822 = vmatmul.mubr.f32.gmra.mrb[8].mxu0 %v2813_v33  ;;  %2481 = vset.pattern.permute.xlu1 %v2510_v41 }
  0xad   :  { %827 = vmatprep.mubr.f32.mxu0 %v3452_v55  ;;  %2147 = vperm.xlu1 %2481, %v3140_v36  }
  0xae   :  { %1734 = vmatmul.mubr.f32.gmra.mrb[8].mxu1 %v2813_v33 }
  0xaf   :  { %1739 = vmatprep.mubr.f32.mxu1 %v3452_v55 }
  0xb0   :  { %829 = vmatmul.mubr.f32.gmra.mrb[10].mxu0 %v2815_v45 }
  0xb1   :  { %834 = vmatprep.mubr.f32.mxu0 %v3452_v55  ;;  %2482 = vset.pattern.permute.xlu1 %v2511_v47 }
  0xb2   :  { %1741 = vmatmul.mubr.f32.gmra.mrb[10].mxu1 %v2815_v45  ;;  %2171 = vperm.xlu1 %2482, %v3140_v36  }
  0xb3   :  { %1746 = vmatprep.mubr.f32.mxu1 %v3452_v55 }
  0xb4   :  { %836 = vmatmul.mubr.f32.gmra.mrb[12].mxu0 %v2858_v3 }
  0xb5   :  { %841 = vmatprep.mubr.f32.mxu0 %v3452_v55 }
  0xb6   :  { %1748 = vmatmul.mubr.f32.gmra.mrb[12].mxu1 %v2858_v3  ;;  %v3235_v25 = vpop.permute.xlu1 %1911 }
  0xb7   :  { %1753 = vmatprep.mubr.f32.mxu1 %v3452_v55  ;;  %v2001_v57 = vpop.permute.xlu0 %2000 }
  0xb8   :  { %843 = vmatmul.mubr.f32.gmra.mrb[14].mxu0 %v2865_v30 }
  0xb9   :  { %923 = vmatprep.mubr.f32.mxu0 %v3452_v55 }
  0xba   :  { %1755 = vmatmul.mubr.f32.gmra.mrb[14].mxu1 %v2865_v30  ;;  %v3237_v39 = vpop.permute.xlu1 %1916 }
  0xbb   :  { %1835 = vmatprep.mubr.f32.mxu1 %v3452_v55  ;;  %v3241_v59 = vpop.permute.xlu0 %2004 }
  0xbc   :  { %925 = vmatmul.mubr.f32.vlgmr.msra.gmra.mrb[0].mxu0 %v2676_v5 }
  0xbd   :  { %930 = vmatprep.mubr.f32.mxu0 %v3452_v55 }
  0xbe   :  { %1837 = vmatmul.mubr.f32.vlgmr.msra.gmra.mrb[0].mxu1 %v2676_v5 }
  0xbf   :  { %1842 = vmatprep.mubr.f32.mxu1 %v3452_v55 }
  0xc0   :  { %932 = vmatmul.mubr.f32.gmra.mrb[2].mxu0 %v2734_v29 }
  0xc1   :  { %937 = vmatprep.mubr.f32.mxu0 %v3452_v55 }
  0xc2   :  { %1844 = vmatmul.mubr.f32.gmra.mrb[2].mxu1 %v2734_v29 }
  0xc3   :  { %1849 = vmatprep.mubr.f32.mxu1 %v3452_v55 }
  0xc4   :  { %939 = vmatmul.mubr.f32.gmra.mrb[4].mxu0 %v2736_v31 }
  0xc5   :  { %944 = vmatprep.mubr.f32.mxu0 %v3452_v55 }
  0xc6   :  { %1851 = vmatmul.mubr.f32.gmra.mrb[4].mxu1 %v2736_v31 }
  0xc7   :  { %1856 = vmatprep.mubr.f32.mxu1 %v3452_v55 }
  0xc8   :  { %946 = vmatmul.mubr.f32.gmra.mrb[6].mxu0 %v2759_v14 }
  0xc9   :  { %951 = vmatprep.mubr.f32.mxu0 %v3452_v55  ;;  %v3245_v63 = vpop.permute.xlu0 %2012 }
  0xca   :  { %1858 = vmatmul.mubr.f32.gmra.mrb[6].mxu1 %v2759_v14  ;;  %v3239_v46 = vpop.permute.xlu1 %1940 }
  0xcb   :  { %1863 = vmatprep.mubr.f32.mxu1 %v3452_v55 }
  0xcc   :  { %953 = vmatmul.mubr.f32.gmra.mrb[8].mxu0 %v2813_v33 }
  0xcd   :  { %958 = vmatprep.mubr.f32.mxu0 %v3452_v55 }
  0xce   :  { %1865 = vmatmul.mubr.f32.gmra.mrb[8].mxu1 %v2813_v33 }
  0xcf   :  { %1870 = vmatprep.mubr.f32.mxu1 %v3452_v55  ;;  %v1937_v5 = vpop.permute.xlu0 %1936 }
  0xd0   :  { %960 = vmatmul.mubr.f32.gmra.mrb[10].mxu0 %v2815_v45  ;;  %v1969_v48 = vpop.permute.xlu1 %1968 }
  0xd1   :  { %965 = vmatprep.mubr.f32.mxu0 %v3452_v55 }
  0xd2   :  { %1872 = vmatmul.mubr.f32.gmra.mrb[10].mxu1 %v2815_v45 }
  0xd3   :  { %1877 = vmatprep.mubr.f32.mxu1 %v3452_v55 }
  0xd4   :  { %967 = vmatmul.mubr.f32.gmra.mrb[12].mxu0 %v2858_v3  ;;  %v1973_v58 = vpop.permute.xlu1 %1972 }
  0xd5   :  { %972 = vmatprep.mubr.f32.mxu0 %v3452_v55 }
  0xd6   :  { %1879 = vmatmul.mubr.f32.gmra.mrb[12].mxu1 %v2858_v3 }
  0xd7   :  { %1884 = vmatprep.mubr.f32.mxu1 %v3452_v55 }
  0xd8   :  { %974 = vmatmul.mubr.f32.gmra.mrb[14].mxu0 %v2865_v30  ;;  %v3243_v60 = vpop.permute.xlu1 %1976 }
  0xda   :  { %1886 = vmatmul.mubr.f32.gmra.mrb[14].mxu1 %v2865_v30  ;;  %v3251_v30 = vpop.permute.xlu0 %1944 }
  0xde   :  { %v3255_v14 = vpop.permute.xlu0 %1948 }
  0xe8   :  { %v1902_v33 = vpop.permute.xlu0 %1901 }
  0xea   :  { %v3247_v0 = vpop.permute.xlu1 %2008 }
  0xec   :  { %v1907_v32 = vpop.permute.xlu0 %1906 }
  0xef   :  { %v3249_v29 = vpop.permute.xlu1 %1980 }
  0xf3   :  { %v3253_v31 = vpop.permute.xlu1 %2098 }
  0xf8   :  { %v3257_v3 = vpop.permute.xlu1 %2065 }
 0x10a   :  { %v3259_v45 = vpop.permute.xlu1 %2114 }
 0x10f   :  { %v3261_v12 = vpop.permute.xlu1 %2082 }
 0x18f   :  { %v926_v56 = vpop.f32.mrb[0].mxu0 }
 0x190   :  { %v928_v55 = vpop.f32.mrb[1].mxu0  ;;  %v1919_v50 = vmul.f32 %v1902_v33, %v926_v56  ;;  %v1983_v11 = vmul.f32 %v1969_v48, %v926_v56 }
 0x191   :  { %v1838_v43 = vpop.f32.mrb[0].mxu1  ;;  %v1920_v18 = vmul.f32 %v1902_v33, %v928_v55  ;;  %v1984_v17 = vmul.f32 %v1969_v48, %v928_v55 }
 0x192   :  { %v1840_v22 = vpop.f32.mrb[1].mxu1  ;;  %v1921_v10 = vmul.f32 %v1902_v33, %v1838_v43  ;;  %v1985_v44 = vmul.f32 %v1969_v48, %v1838_v43  ;;  %v3263_v15 = vadd.f32 %v1937_v5, %v1919_v50  ;;  %v2015_v8 = vadd.f32 %v2001_v57, %v1983_v11 }
 0x193   :  { %v1922_v21 = vmul.f32 %v1902_v33, %v1840_v22  ;;  %v933_v35 = vpop.f32.mrb[2].mxu0  ;;  %v1986_v19 = vmul.f32 %v1969_v48, %v1840_v22  ;;  %v3267_v26 = vadd.f32 %v1937_v5, %v1920_v18  ;;  %v2016_v61 = vadd.f32 %v2001_v57, %v1984_v17  ;;  %v3283_v48 = vpop.permute.xlu1 %2102 }
 0x194   :  { %v935_v24 = vpop.f32.mrb[3].mxu0  ;;  %v3265_v7 = vadd.f32 %v1937_v5, %v1921_v10  ;;  %v2017_v20 = vadd.f32 %v2001_v57, %v1985_v44  ;;  %v1923_v40 = vmul.f32 %v1907_v32, %v933_v35  ;;  %v1987_v42 = vmul.f32 %v1973_v58, %v933_v35 }
 0x195   :  { %v1845_v27 = vpop.f32.mrb[2].mxu1  ;;  %v3269_v28 = vadd.f32 %v1937_v5, %v1922_v21  ;;  %v1924_v49 = vmul.f32 %v1907_v32, %v935_v24  ;;  %v1988_v62 = vmul.f32 %v1973_v58, %v935_v24  ;;  %v2018_v34 = vadd.f32 %v2001_v57, %v1986_v19 }
 0x196   :  { %v1847_v52 = vpop.f32.mrb[3].mxu1  ;;  %v1925_v41 = vmul.f32 %v1907_v32, %v1845_v27  ;;  %v1989_v47 = vmul.f32 %v1973_v58, %v1845_v27  ;;  %v3276_v23 = vadd.f32 %v3239_v46, %v1923_v40  ;;  %v2019_v56 = vadd.f32 %v3241_v59, %v1987_v42 }
 0x197   :  { %v940_v51 = vpop.f32.mrb[4].mxu0  ;;  %v1926_v1 = vmul.f32 %v1907_v32, %v1847_v52  ;;  %v1990_v9 = vmul.f32 %v1973_v58, %v1847_v52  ;;  %v3286_v57 = vadd.f32 %v3239_v46, %v1924_v49  ;;  %v2020_v11 = vadd.f32 %v3241_v59, %v1988_v62 }
 0x198   :  { %v942_v6 = vpop.f32.mrb[5].mxu0  ;;  %v1927_v37 = vmul.f32 %v3235_v25, %v940_v51  ;;  %v1991_v38 = vmul.f32 %v3243_v60, %v940_v51  ;;  %v3279_v4 = vadd.f32 %v3239_v46, %v1925_v41  ;;  %v2021_v43 = vadd.f32 %v3241_v59, %v1989_v47 }
 0x199   :  { %v1852_v53 = vpop.f32.mrb[4].mxu1  ;;  %v1928_v54 = vmul.f32 %v3235_v25, %v942_v6  ;;  %v1992_v58 = vmul.f32 %v3243_v60, %v942_v6  ;;  %v3292_v55 = vadd.f32 %v3239_v46, %v1926_v1  ;;  %v2022_v10 = vadd.f32 %v3241_v59, %v1990_v9 }
 0x19a   :  { %v1854_v13 = vpop.f32.mrb[5].mxu1  ;;  %v1929_v2 = vmul.f32 %v3235_v25, %v1852_v53  ;;  %v1993_v16 = vmul.f32 %v3243_v60, %v1852_v53  ;;  %v3298_v44 = vadd.f32 %v3251_v30, %v1927_v37  ;;  %v2023_v21 = vadd.f32 %v3247_v0, %v1991_v38 }
 0x19b   :  { %v1930_v36 = vmul.f32 %v3235_v25, %v1854_v13  ;;  %v947_v5 = vpop.f32.mrb[6].mxu0  ;;  %v1994_v22 = vmul.f32 %v3243_v60, %v1854_v13  ;;  %v3306_v46 = vadd.f32 %v3251_v30, %v1928_v54  ;;  %v3317_v40 = vadd.f32 %v3247_v0, %v1992_v58 }
 0x19c   :  { %v949_v50 = vpop.f32.mrb[7].mxu0  ;;  %v3301_v18 = vadd.f32 %v3251_v30, %v1929_v2  ;;  %v2025_v32 = vadd.f32 %v3247_v0, %v1993_v16  ;;  %v1931_v17 = vmul.f32 %v3237_v39, %v947_v5  ;;  %v1995_v35 = vmul.f32 %v3249_v29, %v947_v5 }
 0x19d   :  { %v1859_v33 = vpop.f32.mrb[6].mxu1  ;;  %v3309_v60 = vadd.f32 %v3251_v30, %v1930_v36  ;;  %v1932_v19 = vmul.f32 %v3237_v39, %v949_v50  ;;  %v1996_v41 = vmul.f32 %v3249_v29, %v949_v50  ;;  %v3323_v9 = vadd.f32 %v3247_v0, %v1994_v22 }
 0x19e   :  { %v1861_v25 = vpop.f32.mrb[7].mxu1  ;;  %v1933_v59 = vmul.f32 %v3237_v39, %v1859_v33  ;;  %v1997_v27 = vmul.f32 %v3249_v29, %v1859_v33  ;;  %v3326_v6 = vadd.f32 %v3255_v14, %v1931_v17  ;;  %v3338_v0 = vadd.f32 %v3245_v63, %v1995_v35 }
 0x19f   :  { %v954_v24 = vpop.f32.mrb[8].mxu0  ;;  %v1934_v30 = vmul.f32 %v3237_v39, %v1861_v25  ;;  %v1998_v53 = vmul.f32 %v3249_v29, %v1861_v25  ;;  %v3344_v2 = vadd.f32 %v3255_v14, %v1932_v19 }
 0x1a0   :  { %v2031_v42 = vmul.f32 %v2015_v8, %v954_v24  ;;  %v956_v49 = vpop.f32.mrb[9].mxu0  ;;  %v3329_v13 = vadd.f32 %v3255_v14, %v1933_v59  ;;  %v3333_v8 = vpop.permute.xlu1 %2118  ;;  %v3341_v38 = vadd.f32 %v3245_v63, %v1997_v27 }
 0x1a1   :  { %v1866_v52 = vpop.f32.mrb[8].mxu1  ;;  %v2032_v62 = vmul.f32 %v2016_v61, %v956_v49  ;;  %v3357_v5 = vadd.f32 %v3245_v63, %v1998_v53 }
 0x1a2   :  { %v2033_v47 = vmul.f32 %v2017_v20, %v1866_v52  ;;  %v1868_v51 = vpop.f32.mrb[9].mxu1  ;;  %v2047_v37 = vadd.f32 %v2031_v42, %v3263_v15  ;;  %v3347_v15 = vadd.f32 %v3255_v14, %v1934_v30 }
 0x1a3   :  { %v2034_v1 = vmul.f32 %v2018_v34, %v1868_v51  ;;  %v2048_v20 = vadd.f32 %v2032_v62, %v3267_v26  ;;  %v961_v61 = vpop.f32.mrb[10].mxu0 }
 0x1a4   :  { %v2049_v39 = vadd.f32 %v2033_v47, %v3265_v7  ;;  %v2073_v7 = vmul.f32 %v3257_v3, %v2047_v37  ;;  %v963_v16 = vpop.f32.mrb[11].mxu0  ;;  %v2105_v54 = vmul.f32 %v3253_v31, %v2047_v37  ;;  %v2035_v22 = vmul.f32 %v2019_v56, %v961_v61  ;;  %v2071_v47 = vpop.permute.xlu0 %2070 }
 0x1a5   :  { %v2050_v29 = vadd.f32 %v2034_v1, %v3269_v28  ;;  %v1873_v34 = vpop.f32.mrb[10].mxu1  ;;  %v3351_v28 = vadd.f32 %v3245_v63, %v1996_v41  ;;  %v2074_v33 = vmul.f32 %v3257_v3, %v2048_v20  ;;  %v2106_v25 = vmul.f32 %v3253_v31, %v2048_v20 }
 0x1a6   :  { %v1875_v26 = vpop.f32.mrb[11].mxu1  ;;  %v2075_v36 = vmul.f32 %v3257_v3, %v2049_v39  ;;  %v2107_v58 = vmul.f32 %v3253_v31, %v2049_v39  ;;  %v2037_v50 = vmul.f32 %v2021_v43, %v1873_v34  ;;  %v2036_v59 = vmul.f32 %v2020_v11, %v963_v16 }
 0x1a7   :  { %v2076_v14 = vmul.f32 %v3257_v3, %v2050_v29  ;;  %v2108_v17 = vmul.f32 %v3253_v31, %v2050_v29  ;;  %v2038_v35 = vmul.f32 %v2022_v10, %v1875_v26  ;;  %v968_v27 = vpop.f32.mrb[12].mxu0  ;;  %v2089_v24 = vadd.f32 %v3261_v12, %v2073_v7 }
 0x1a8   :  { %v2051_v52 = vadd.f32 %v2035_v22, %v3276_v23  ;;  %v2053_v63 = vadd.f32 %v2037_v50, %v3279_v4  ;;  %v2039_v41 = vmul.f32 %v2023_v21, %v968_v27  ;;  %v970_v30 = vpop.f32.mrb[13].mxu0  ;;  %v2091_v3 = vadd.f32 %v3261_v12, %v2075_v36  ;;  %v2087_v4 = vpop.permute.xlu1 %2086 }
 0x1a9   :  { %v1880_v19 = vpop.f32.mrb[12].mxu1  ;;  %v2052_v56 = vadd.f32 %v2036_v59, %v3286_v57  ;;  %v2054_v43 = vadd.f32 %v2038_v35, %v3292_v55  ;;  %v2090_v11 = vadd.f32 %v3261_v12, %v2074_v33  ;;  %v2092_v10 = vadd.f32 %v3261_v12, %v2076_v14 }
 0x1aa   :  { %v1882_v42 = vpop.f32.mrb[13].mxu1  ;;  %v2041_v31 = vmul.f32 %v2025_v32, %v1880_v19  ;;  %v2109_v49 = vmul.f32 %v3283_v48, %v2051_v52  ;;  %v2111_v23 = vmul.f32 %v3283_v48, %v2053_v63  ;;  %v2077_v21 = vmul.f32 %v2071_v47, %v2051_v52 }
 0x1ab   :  { %v2079_v51 = vmul.f32 %v2071_v47, %v2053_v63  ;;  %v2121_v53 = vadd.f32 %v3259_v45, %v2105_v54  ;;  %v2123_v62 = vadd.f32 %v3259_v45, %v2107_v58  ;;  %v975_v57 = vpop.f32.mrb[14].mxu0  ;;  %v2078_v55 = vmul.f32 %v2071_v47, %v2052_v56 }
 0x1ac   :  { %v2110_v32 = vmul.f32 %v3283_v48, %v2052_v56  ;;  %v2055_v37 = vadd.f32 %v2039_v41, %v3298_v44  ;;  %v2057_v12 = vadd.f32 %v2041_v31, %v3301_v18  ;;  %v977_v39 = vpop.f32.mrb[15].mxu0  ;;  %v2080_v29 = vmul.f32 %v2071_v47, %v2054_v43  ;;  %v2148_v22 = vpop.permute.xlu1 %2147 }
 0x1ad   :  { %v1887_v1 = vpop.f32.mrb[14].mxu1  ;;  %v2112_v61 = vmul.f32 %v3283_v48, %v2054_v43  ;;  %v2040_v34 = vmul.f32 %v3317_v40, %v970_v30  ;;  %v2042_v7 = vmul.f32 %v3323_v9, %v1882_v42  ;;  %v2125_v16 = vadd.f32 %v3333_v8, %v2109_v49 }
 0x1ae   :  { %v1889_v20 = vpop.f32.mrb[15].mxu1  ;;  %v2127_v26 = vadd.f32 %v3333_v8, %v2111_v23  ;;  %v2129_v54 = vmul.f32 %v2121_v53, %v2055_v37  ;;  %v2131_v36 = vmul.f32 %v2123_v62, %v2057_v12  ;;  %v2122_v44 = vadd.f32 %v3259_v45, %v2106_v25 }
 0x1af   :  { %v2056_v58 = vadd.f32 %v2040_v34, %v3306_v46  ;;  %v2058_v18 = vadd.f32 %v2042_v7, %v3309_v60  ;;  %v2124_v33 = vadd.f32 %v3259_v45, %v2108_v17  ;;  %v2043_v40 = vmul.f32 %v3338_v0, %v975_v57  ;;  %v2164_v45 = vpop.permute.xlu0 %2163 }
 0x1b0   :  { %v2137_v14 = vadd.f32 %v2129_v54, %v2089_v24  ;;  %v2139_v48 = vadd.f32 %v2131_v36, %v2091_v3  ;;  %v2045_v9 = vmul.f32 %v3341_v38, %v1887_v1  ;;  %v2093_v35 = vadd.f32 %v2087_v4, %v2077_v21  ;;  %v2172_v31 = vpop.permute.xlu1 %2171 }
 0x1b1   :  { %v2130_v50 = vmul.f32 %v2122_v44, %v2056_v58  ;;  %v2132_v59 = vmul.f32 %v2124_v33, %v2058_v18  ;;  %v2044_v27 = vmul.f32 %v3351_v28, %v977_v39  ;;  %v2095_v19 = vadd.f32 %v2087_v4, %v2079_v51 }
 0x1b2   :  { %v2059_v46 = vadd.f32 %v2043_v40, %v3326_v6  ;;  %v2061_v25 = vadd.f32 %v2045_v9, %v3329_v13  ;;  %v2046_v60 = vmul.f32 %v3357_v5, %v1889_v20  ;;  %v2126_v38 = vadd.f32 %v3333_v8, %v2110_v32 }
 0x1b3   :  { %v2138_v17 = vadd.f32 %v2130_v50, %v2090_v11  ;;  %v2140_v24 = vadd.f32 %v2132_v59, %v2092_v10  ;;  %v2060_v0 = vadd.f32 %v2044_v27, %v3344_v2  ;;  %v2128_v28 = vadd.f32 %v3333_v8, %v2112_v61  ;;  %v2156_v23 = vpop.permute.xlu0 %2155 }
 0x1b4   :  { %v2133_v52 = vmul.f32 %v2125_v16, %v2059_v46  ;;  %v2135_v63 = vmul.f32 %v2127_v26, %v2061_v25  ;;  %v2062_v41 = vadd.f32 %v2046_v60, %v3347_v15  ;;  %v2094_v30 = vadd.f32 %v2087_v4, %v2078_v55 }
 0x1b5   :  { %v2096_v42 = vadd.f32 %v2087_v4, %v2080_v29  ;;  %v2134_v6 = vmul.f32 %v2126_v38, %v2060_v0  ;;  %v2150_v3 = vmul.f32 %v2148_v22, %v2137_v14  ;;  %v2152_v43 = vmul.f32 %v2148_v22, %v2139_v48 }
 0x1b6   :  { %v2141_v13 = vadd.f32 %v2133_v52, %v2093_v35  ;;  %v2143_v56 = vadd.f32 %v2135_v63, %v2095_v19  ;;  %v2136_v5 = vmul.f32 %v2128_v28, %v2062_v41  ;;  %v2151_v10 = vmul.f32 %v2148_v22, %v2138_v17 }
 0x1b7   :  { %v2142_v11 = vadd.f32 %v2134_v6, %v2094_v30  ;;  %v2153_v2 = vmul.f32 %v2148_v22, %v2140_v24  ;;  %v2166_v47 = vmul.f32 %v2164_v45, %v2137_v14  ;;  %v2167_v21 = vmul.f32 %v2164_v45, %v2138_v17 }
 0x1b8   :  { %v2144_v49 = vadd.f32 %v2136_v5, %v2096_v42  ;;  %v2168_v51 = vmul.f32 %v2164_v45, %v2139_v48  ;;  %v2169_v15 = vmul.f32 %v2164_v45, %v2140_v24  ;;  %v2158_v57 = vadd.f32 %v2156_v23, %v2150_v3 }
 0x1b9   :  { %v2174_v53 = vadd.f32 %v2172_v31, %v2166_v47  ;;  %v2175_v8 = vadd.f32 %v2172_v31, %v2167_v21  ;;  %v2159_v1 = vadd.f32 %v2156_v23, %v2151_v10  ;;  %v2160_v55 = vadd.f32 %v2156_v23, %v2152_v43 }
 0x1ba   :  { %v2176_v62 = vadd.f32 %v2172_v31, %v2168_v51  ;;  %v2177_v4 = vadd.f32 %v2172_v31, %v2169_v15  ;;  %v2161_v37 = vadd.f32 %v2156_v23, %v2153_v2 }
 0x1bb   :  { %v2178_v32 = vmul.f32 %v2174_v53, %v2141_v13  ;;  %v2179_v12 = vmul.f32 %v2175_v8, %v2142_v11 }
 0x1bc   :  { %v2180_v39 = vmul.f32 %v2176_v62, %v2143_v56  ;;  %v2181_v20 = vmul.f32 %v2177_v4, %v2144_v49 }
 0x1bd   :  { %v2182_v29 = vadd.f32 %v2178_v32, %v2158_v57  ;;  %v2183_v61 = vadd.f32 %v2179_v12, %v2159_v1 }
 0x1be   :  { %v2184_v34 = vadd.f32 %v2180_v39, %v2160_v55  ;;  %v2185_v7 = vadd.f32 %v2181_v20, %v2161_v37 }
 0x1bf   :  { %2186 = vst [vmem:[#allocation2] sm:$0xff] %v2182_v29  ;;  %2187 = vst [vmem:[#allocation2 + $0x8] sm:$0xff] %v2183_v61 }
 0x1c0   :  { %2188 = vst [vmem:[#allocation2 + $0x10] sm:$0xff] %v2184_v34  ;;  %2189 = vst [vmem:[#allocation2 + $0x18] sm:$0xff] %v2185_v7 }
 0x1c1   :  { %2496 = shalt.err (!%p2493_p4)
}
 0x1c2   :  { %s2497_s29 = scalar_lea.hbm %s3412_s3, 512 }
 0x1c3   :  { %p2498_p5 = scmp.ne.s32.totalorder %s3412_s3, %s2497_s29  ;;  %p2501_p6 = scmp.lt.u32.totalorder %s2497_s29, %s3412_s3 }
 0x1c5   :  { %p2503_p7 = pnand %p2501_p6, %p2498_p5 }
 0x1c7   :  { %2506 = shalt.err (!%p2503_p7)
}
 0x1c8   :  { %2199 = dma.vmem_to_hbm [thread:$0]  %s2197_s26, 512, %s3412_s3, [#allocation3]  }
 0x1c9   :  { %2507 = dma.done.wait [#allocation3], 512  }
 0x1ca   :  { %2508 = vsyncadd [#allocation3], 4294966784 }
 0x1cb   :  { %2203 = vsyncpa [#allocation3], 1 }

</bundles_post_ra>
